<compile_context>
chip_gen: v7x
topology: tpu7x:2x2x1
jax: 0.10.0
libtpu: 0.0.40
codegen_flags: <defaults>
</compile_context>

<pallas_src>
import jax
import jax.numpy as jnp
from jax.experimental import pallas as pl
from jax.experimental.pallas import tpu as pltpu


def _qus_embedding_map_kernel(ids_ref, emb_ref, w_ref, b_ref, o_ref):
    # ids_ref: (T, 1) int32   -- this tile's token ids
    # emb_ref: (V, D)         -- embedding table (resident)
    # w_ref:   (D, H)         -- linear weight, transposed PyTorch W (resident)
    # b_ref:   (1, H)         -- linear bias (resident)
    # o_ref:   (T, H)         -- output tile
    T = ids_ref.shape[0]
    V = emb_ref.shape[0]

    ids = ids_ref[...]                                              # (T, 1)

    # Lane-dense one-hot: tokens on sublanes, vocab on lanes.
    iota_v = jax.lax.broadcasted_iota(jnp.int32, (T, V), 1)         # (T, V)
    onehot = (iota_v == ids).astype(emb_ref.dtype)                  # (T, V)

    # Gather on the MXU: (T, V) @ (V, D) -> (T, D), f32 accumulation.
    gathered = jnp.dot(onehot, emb_ref[...],
                       preferred_element_type=jnp.float32)          # (T, D)

    # Linear: (T, D) @ (D, H) + b, f32 accumulation.
    h = jnp.dot(gathered.astype(w_ref.dtype), w_ref[...],
                preferred_element_type=jnp.float32)                 # (T, H)
    h = h + b_ref[...].astype(jnp.float32)

    o_ref[...] = h.astype(o_ref.dtype)


def _resident_spec(shape):
    """BlockSpec for an operand that stays in VMEM for the whole grid.

    Single-buffered (pipeline_mode=pl.Buffered(1)) when this jax version
    supports it — a constant-index-map operand is never re-fetched, so the
    second buffer is pure waste; falls back to the default spec otherwise.
    """
    index_map = lambda *_: (0,) * len(shape)
    try:
        return pl.BlockSpec(shape, index_map, pipeline_mode=pl.Buffered(1))
    except (TypeError, AttributeError):
        return pl.BlockSpec(shape, index_map)


def qus_embedding_map(qus, emb_table, w, b, *, row_tile=128):
    """qus: (N, S) int token ids; emb_table: (V, D); w: (D, H) (= W_pt.T); b: (H,)."""
    N, S = qus.shape
    V, D = emb_table.shape
    H = w.shape[1]

    # Fold (N, S) -> rows; pad to >=2 row tiles so the grid can shard across
    # both v7x TensorCores (padding rows use token 0 and are sliced off below).
    rows = N * S
    num_tiles = max(2, pl.cdiv(rows, row_tile))
    rows_padded = num_tiles * row_tile

    ids_flat = qus.reshape(-1).astype(jnp.int32)
    ids2d = jnp.pad(ids_flat, (0, rows_padded - rows)).reshape(rows_padded, 1)
    b2d = b.reshape(1, H)

    # VMEM budget sized from the actual buffers (x2 headroom, >=16 MiB floor).
    bytes_const = 2 * (V * D + D * H + H) * 4          # covers double-buffer fallback
    bytes_tiles = 2 * (row_tile * 1 * 4 + row_tile * H * 4)
    bytes_tmp = row_tile * (V + D + 2 * H) * 4
    vmem_limit = max(16 * 1024 * 1024, 2 * (bytes_const + bytes_tiles + bytes_tmp))

    grid_spec = pltpu.PrefetchScalarGridSpec(
        num_scalar_prefetch=0,
        grid=(num_tiles,),
        in_specs=[
            pl.BlockSpec((row_tile, 1), lambda i: (i, 0)),   # this tile's ids
            _resident_spec((V, D)),                          # embedding table
            _resident_spec((D, H)),                          # linear weight (W.T)
            _resident_spec((1, H)),                          # linear bias
        ],
        out_specs=pl.BlockSpec((row_tile, H), lambda i: (i, 0)),
    )

    out_flat = pl.pallas_call(
        _qus_embedding_map_kernel,
        out_shape=jax.ShapeDtypeStruct((rows_padded, H), w.dtype),
        grid_spec=grid_spec,
        compiler_params=pltpu.CompilerParams(
            dimension_semantics=("parallel",),
            vmem_limit_bytes=int(vmem_limit)),
    )(ids2d, emb_table, w, b2d)

    # Drop the padding rows and restore the (N, S, H) layout (leading-dim
    # merge/split -- free outside the kernel).
    return out_flat[:rows].reshape(N, S, H)


def _reference(qus, emb_table, w, b):
    gathered = emb_table[qus]        # (N, S, D)
    return gathered @ w + b          # (N, S, H)


if __name__ == "__main__":
    key = jax.random.PRNGKey(0)
    k_ids, k_emb, k_w, k_b = jax.random.split(key, 4)

    N, S = 2, 16            # batch, sequence length
    V, D, H = 256, 64, 128  # word_size, embedding_dim, hidden_size

    qus = jax.random.randint(k_ids, (N, S), 0, V, dtype=jnp.int32)

    # TODO(synk): GloVe initialization (init_embedding(glove_path)) replaced by
    # a random table -- no file I/O allowed in this script.
    emb_table = jax.random.normal(k_emb, (V, D), dtype=jnp.float32)

    # PyTorch Linear stores weight as (H, D); the kernel takes the transposed
    # (D, H) layout so the forward is a plain row-major matmul.
    w_pt = jax.random.normal(k_w, (H, D), dtype=jnp.float32) * 0.05
    w = w_pt.T                                                    # (D, H)
    b = jax.random.normal(k_b, (H,), dtype=jnp.float32) * 0.05

    out = qus_embedding_map(qus, emb_table, w, b)
    out = jax.block_until_ready(out)

    ref = _reference(qus, emb_table, w, b)
    assert out.shape == (N, S, H)
    assert jnp.allclose(out, ref, atol=1e-3, rtol=1e-3)

    print("KERNEL_OK")
</pallas_src>

<mosaic_0001>
module attributes {stable_mosaic.version = 11 : i64} {
  func.func @_qus_embedding_map_kernel(%arg0: i32, %arg1: memref<128x1xi32, #tpu.memory_space<vmem>>, %arg2: memref<256x64xf32, #tpu.memory_space<vmem>>, %arg3: memref<64x128xf32, #tpu.memory_space<vmem>>, %arg4: memref<1x128xf32, #tpu.memory_space<vmem>>, %arg5: memref<128x128xf32, #tpu.memory_space<vmem>>) attributes {dimension_semantics = [#tpu.dimension_semantics<parallel>], iteration_bounds = array<i64: 2>, scalar_prefetch = 0 : i64, scratch_operands = 0 : i64, tpu.core_type = #tpu.core_type<tc>, window_params = [{transform_indices = @transform_0, window_bounds = array<i64: 128, 1>}, {pipeline_mode = #tpu.pipeline_mode<synchronous>, transform_indices = @transform_1, window_bounds = array<i64: 256, 64>}, {pipeline_mode = #tpu.pipeline_mode<synchronous>, transform_indices = @transform_2, window_bounds = array<i64: 64, 128>}, {pipeline_mode = #tpu.pipeline_mode<synchronous>, transform_indices = @transform_3, window_bounds = array<i64: 1, 128>}, {transform_indices = @transform_4, window_bounds = array<i64: 128, 128>}]} {
    %c0 = arith.constant 0 : index
    %c0_0 = arith.constant 0 : index
    %0 = vector.load %arg1[%c0, %c0_0] : memref<128x1xi32, #tpu.memory_space<vmem>>, vector<128x1xi32>
    %1 = tpu.iota {dimensions = array<i32: 1>} : vector<128x256xi32>
    %2 = vector.broadcast %0 : vector<128x1xi32> to vector<128x256xi32>
    %3 = arith.cmpi eq, %1, %2 : vector<128x256xi32>
    %4 = arith.extui %3 : vector<128x256xi1> to vector<128x256xi32>
    %5 = arith.sitofp %4 : vector<128x256xi32> to vector<128x256xf32>
    %c0_1 = arith.constant 0 : index
    %c0_2 = arith.constant 0 : index
    %6 = vector.load %arg2[%c0_1, %c0_2] : memref<256x64xf32, #tpu.memory_space<vmem>>, vector<256x64xf32>
    %cst = arith.constant dense<0.000000e+00> : vector<128x64xf32>
    %7 = tpu.matmul %5, %6, %cst {dimension_numbers = #tpu.dot_dimension_numbers<[1], [0], [0], [1], [0, 0, 1, 1], [], []>} : vector<128x256xf32>, vector<256x64xf32>, vector<128x64xf32> -> vector<128x64xf32>
    %c0_3 = arith.constant 0 : index
    %c0_4 = arith.constant 0 : index
    %8 = vector.load %arg3[%c0_3, %c0_4] : memref<64x128xf32, #tpu.memory_space<vmem>>, vector<64x128xf32>
    %cst_5 = arith.constant dense<0.000000e+00> : vector<128x128xf32>
    %9 = tpu.matmul %7, %8, %cst_5 {dimension_numbers = #tpu.dot_dimension_numbers<[1], [0], [0], [1], [0, 0, 1, 1], [], []>} : vector<128x64xf32>, vector<64x128xf32>, vector<128x128xf32> -> vector<128x128xf32>
    %c0_6 = arith.constant 0 : index
    %c0_7 = arith.constant 0 : index
    %10 = vector.load %arg4[%c0_6, %c0_7] : memref<1x128xf32, #tpu.memory_space<vmem>>, vector<1x128xf32>
    %11 = vector.broadcast %10 : vector<1x128xf32> to vector<128x128xf32>
    %12 = arith.addf %9, %11 : vector<128x128xf32>
    %c0_8 = arith.constant 0 : index
    %c0_9 = arith.constant 0 : index
    %13 = vector.load %arg5[%c0_8, %c0_9] : memref<128x128xf32, #tpu.memory_space<vmem>>, vector<128x128xf32>
    tpu.vector_store %arg5[%c0_8, %c0_9], %12 {strides = array<i32>} : memref<128x128xf32, #tpu.memory_space<vmem>>, vector<128x128xf32>,
    return
  }
  func.func @transform_0(%arg0: i32) -> (i32, i32) {
    %c0_i32 = arith.constant 0 : i32
    %c0_i32_0 = arith.constant 0 : i32
    return %arg0, %c0_i32 : i32, i32
  }
  func.func @transform_1(%arg0: i32) -> (i32, i32) {
    %c0_i32 = arith.constant 0 : i32
    %c0_i32_0 = arith.constant 0 : i32
    %c0_i32_1 = arith.constant 0 : i32
    return %c0_i32, %c0_i32_0 : i32, i32
  }
  func.func @transform_2(%arg0: i32) -> (i32, i32) {
    %c0_i32 = arith.constant 0 : i32
    %c0_i32_0 = arith.constant 0 : i32
    %c0_i32_1 = arith.constant 0 : i32
    return %c0_i32, %c0_i32_0 : i32, i32
  }
  func.func @transform_3(%arg0: i32) -> (i32, i32) {
    %c0_i32 = arith.constant 0 : i32
    %c0_i32_0 = arith.constant 0 : i32
    %c0_i32_1 = arith.constant 0 : i32
    return %c0_i32, %c0_i32_0 : i32, i32
  }
  func.func @transform_4(%arg0: i32) -> (i32, i32) {
    %c0_i32 = arith.constant 0 : i32
    %c0_i32_0 = arith.constant 0 : i32
    return %arg0, %c0_i32 : i32, i32
  }
}

</mosaic_0001>

<bundles_post_ra>
// kernel: tpu_custom_call.1
= control target key start
LH: loop header
LB: loop body
LE: loop exit
PB: predicated region body
PF: predicated region fallthrough
CT: control target
= control target key end

     0   :  { %9 = vsyncpa [#allocation3], 0  ;;  %s1632_s0 = inlined_call_operand.vmem [shape: s32[256,1], index: 0, kind: input, shape index: {}]   ;;  %s1633_s1 = inlined_call_operand.vmem [shape: f32[256,64], index: 1, kind: input, shape index: {}]   ;;  %s1634_s2 = inlined_call_operand.vmem [shape: f32[64,128], index: 2, kind: input, shape index: {}]   ;;  %s1635_s3 = inlined_call_operand.vmem [shape: f32[1,128], index: 3, kind: input, shape index: {}]   ;;  %s1636_s4 = inlined_call_operand.hbm [shape: f32[256,128], index: 4, kind: output, shape index: {}]  }
   0x1   :  { %11 = vsyncpa [#allocation3 + $0x1], 0  ;;  %s1281_s15 = smov 0   ;;  %s1283_s16 = smov 0  }
   0x2   :  { %s1285_s17 = smov 0   ;;  %s1287_s18 = smov 0  }
   0x3 LB: > { %s1302_s19 = sadd.s32 4294967295, %s1249_s18   ;;  %s840_s20 = sadd.s32 4294967294, %s1249_s18   ;;  %s1249_s18 = sphi %s1287_s18, %s1642_s18   ;;  %s1245_s17 = sphi %s1285_s17, %s1641_s17   ;;  %s1241_s16 = sphi %s1283_s16, %s1640_s16   ;;  %s1237_s15 = sphi %s1281_s15, %s1639_s15  }
   0x4   : > { %s1306_s21 = sadd.s32 1, %s1249_s18   ;;  %s113_s22 = sadd.s32 1, %s1245_s17 }
   0x5   : > { %s110_s23 = ssub.s32 %s1249_s18, %s1306_s21  ;;  %p123_p0 = scmp.ne.s32.totalorder %s1245_s17, %s1241_s16 }
   0x6   : > { %p111_p1 = scmp.eq.s32.totalorder %s110_s23, 0  ;;  %p124_p2 = scmp.eq.s32.totalorder %s1302_s19, 1 }
   0x7   : > { %p129_p3 = scmp.ne.s32.totalorder %s1241_s16, %s1237_s15  ;;  %p130_p4 = scmp.eq.s32.totalorder %s840_s20, 1 }
   0x8   : > { %s1317_s24 = scalar_select %p111_p1, %s1245_s17, %s113_s22  }
   0x9   : > { %p1319_p5 = por %p124_p2, %p123_p0  ;;  %p1323_p6 = por %p130_p4, %p129_p3 }
   0xa   : > { %p843_p7 = scmp.ge.s32.totalorder %s1249_s18, 1  ;;  %p166_p8 = scmp.lt.s32.totalorder %s1249_s18, 3 }
   0xc   : > { %p167_p9 = pnand %p843_p7, %p166_p8 }
   0xd   : > { %s845_s27 = sshll.u32 (!%p167_p9), %s1302_s19, 4  ;;  %v378_v0 = vld [vmem:[%s1633_s1 + $0x80] sm:$0xff] (!%p167_p9)  ;;  %v379_v1 = vld [vmem:[%s1633_s1 + $0x88] sm:$0xff] (!%p167_p9)  ;;  %v1251_v3 = vmov (!%p167_p9), 0   ;;  %v380_v6 = vld [vmem:[%s1633_s1 + $0x90] sm:$0xff] (!%p167_p9)  ;;  %s189_s30 = sand.u32 (!%p167_p9), 1, %s1241_s16  }
   0xe   : > { %170 = sbr.rel (%p167_p9) target bundleno = 652 (0x28c), region = 36  ;;  %v362_v2 = vld [vmem:[%s1633_s1] sm:$0xff] (!%p167_p9)  ;;  %1186 = vset.pattern.permute.xlu1 (!%p167_p9), %v1251_v3  ;;  %1185 = vset.pattern.permute.xlu0 (!%p167_p9), %v1251_v3  ;;  %p193_p10 = scmp.lt.s32.totalorder (!%p167_p9), %s845_s27, 31  ;;  %v1078_v4 = vpack.c.bf16 (!%p167_p9), %v379_v1, %v378_v0  ;;  %v363_v5 = vld [vmem:[%s1633_s1 + $0x8] sm:$0xff] (!%p167_p9)  ;;  %v381_v7 = vld [vmem:[%s1633_s1 + $0x98] sm:$0xff] (!%p167_p9) }
   0xf   : > { %v1080_v8 = vpack.c.bf16 (!%p167_p9), %v363_v5, %v362_v2  ;;  %v1082_v9 = vpack.c.bf16 (!%p167_p9), %v381_v7, %v380_v6  ;;  %v364_v10 = vld [vmem:[%s1633_s1 + $0x10] sm:$0xff] (!%p167_p9)  ;;  %v365_v11 = vld [vmem:[%s1633_s1 + $0x18] sm:$0xff] (!%p167_p9)  ;;  %v382_v12 = vld [vmem:[%s1633_s1 + $0xa0] sm:$0xff] (!%p167_p9)  ;;  %s844_s5 = sshll.u32 (!%p167_p9), %s189_s30, 7  ;;  %s1253_s14 = smov (!%p167_p9), [#allocation2]  }
  0x10   : > { %1079 = vmatprep.subr.bf16.mxu0 (!%p167_p9), %v1078_v4  ;;  %v383_v13 = vld [vmem:[%s1633_s1 + $0xa8] sm:$0xff] (!%p167_p9)  ;;  %1126 = vmatprep.subr.bf16.mxu1 (!%p167_p9), %v1078_v4  ;;  %v1084_v14 = vpack.c.bf16 (!%p167_p9), %v365_v11, %v364_v10  ;;  %v366_v16 = vld [vmem:[%s1633_s1 + $0x20] sm:$0xff] (!%p167_p9)  ;;  %v384_v18 = vld [vmem:[%s1633_s1 + $0xb0] sm:$0xff] (!%p167_p9)  ;;  %v215_v4 = vlaneseq (!%p167_p9)  ;;  %s1562_s8 = scalar_lea.vmem (!%p167_p9), [#allocation2], %s844_s5  ;;  %s1191_s20 = sshll.u32 (!%p167_p9), %s1253_s14, 4  ;;  %s1192_s20 = int_to_ptr.vmem [resolvable:$false] %s1191_s20 }
  0x11   : > { %1081 = vmatpush3.bf16.msra.mxu0 (!%p167_p9), %v1080_v8  ;;  %1134 = vmatpush3.bf16.msra.mxu1 (!%p167_p9), %v1080_v8  ;;  %v1086_v15 = vpack.c.bf16 (!%p167_p9), %v383_v13, %v382_v12  ;;  %v367_v17 = vld [vmem:[%s1633_s1 + $0x28] sm:$0xff] (!%p167_p9)  ;;  %v385_v21 = vld [vmem:[%s1633_s1 + $0xb8] sm:$0xff] (!%p167_p9)  ;;  %v368_v26 = vld [vmem:[%s1633_s1 + $0x30] sm:$0xff] (!%p167_p9)  ;;  %s778_s10 = sshll.u32 (!%p167_p9), %s1562_s8, 4  ;;  %s1193_s22 = scalar_lea.vmem (!%p167_p9), %s1192_s20, 4096  ;;  %s1585_s10 = int_to_ptr.vmem [resolvable:$true] %s778_s10 }
  0x12   : > { %1083 = vmatprep.subr.bf16.mxu0 (!%p167_p9), %v1082_v9  ;;  %1127 = vmatprep.subr.bf16.mxu1 (!%p167_p9), %v1082_v9  ;;  %v1088_v24 = vpack.c.bf16 (!%p167_p9), %v367_v17, %v366_v16  ;;  %v1090_v25 = vpack.c.bf16 (!%p167_p9), %v385_v21, %v384_v18  ;;  %v369_v27 = vld [vmem:[%s1633_s1 + $0x38] sm:$0xff] (!%p167_p9)  ;;  %v386_v28 = vld [vmem:[%s1633_s1 + $0xc0] sm:$0xff] (!%p167_p9)  ;;  %v387_v29 = vld [vmem:[%s1633_s1 + $0xc8] sm:$0xff] (!%p167_p9)  ;;  %v1453_v5 = vand.u32 (!%p167_p9), 127, %v215_v4  ;;  %v1252_v9 = vmov (!%p167_p9), 1.0   ;;  %p1194_p0 = scmp.lt.s32.totalorder (!%p167_p9), %s1585_s10, %s1192_s20 }
  0x13   : > { %v1092_v32 = vpack.c.bf16 (!%p167_p9), %v369_v27, %v368_v26  ;;  %v1094_v33 = vpack.c.bf16 (!%p167_p9), %v387_v29, %v386_v28  ;;  %v370_v34 = vld [vmem:[%s1633_s1 + $0x40] sm:$0xff] (!%p167_p9)  ;;  %v371_v35 = vld [vmem:[%s1633_s1 + $0x48] sm:$0xff] (!%p167_p9)  ;;  %v388_v36 = vld [vmem:[%s1633_s1 + $0xd0] sm:$0xff] (!%p167_p9) }
  0x14   : > { %v389_v37 = vld [vmem:[%s1633_s1 + $0xd8] sm:$0xff] (!%p167_p9)  ;;  %v1096_v40 = vpack.c.bf16 (!%p167_p9), %v371_v35, %v370_v34  ;;  %v372_v42 = vld [vmem:[%s1633_s1 + $0x50] sm:$0xff] (!%p167_p9)  ;;  %v390_v44 = vld [vmem:[%s1633_s1 + $0xe0] sm:$0xff] (!%p167_p9)  ;;  %v1456_v6 = vadd.s32 (!%p167_p9), 128, %v1453_v5 }
  0x15   : > { %s1644_s27 = smov (!%p193_p10, %s845_s27), 31  ;;  %1085 = vmatpush3.bf16.msra.mxu0 %v1084_v14  ;;  %1135 = vmatpush3.bf16.msra.mxu1 %v1084_v14  ;;  %v1098_v41 = vpack.c.bf16 %v389_v37, %v388_v36  ;;  %v373_v43 = vld [vmem:[%s1633_s1 + $0x58] sm:$0xff]  ;;  %v391_v45 = vld [vmem:[%s1633_s1 + $0xe8] sm:$0xff]  ;;  %v374_v50 = vld [vmem:[%s1633_s1 + $0x60] sm:$0xff] }
  0x16   : > { %s846_s6 = sshll.u32 %s1644_s27, 3  ;;  %1087 = vmatprep.subr.bf16.mxu0 %v1086_v15  ;;  %1128 = vmatprep.subr.bf16.mxu1 %v1086_v15  ;;  %v1100_v48 = vpack.c.bf16 %v373_v43, %v372_v42  ;;  %v1102_v49 = vpack.c.bf16 %v391_v45, %v390_v44  ;;  %v375_v51 = vld [vmem:[%s1633_s1 + $0x68] sm:$0xff]  ;;  %v392_v52 = vld [vmem:[%s1633_s1 + $0xf0] sm:$0xff]  ;;  %v393_v53 = vld [vmem:[%s1633_s1 + $0xf8] sm:$0xff]  ;;  %s1187_s27 = scalar_lea.vmem %s1585_s10, 2048 }
  0x17   : > { %s1363_s9 = scalar_lea.vmem %s1632_s0, %s846_s6  ;;  %v1104_v56 = vpack.c.bf16 %v375_v51, %v374_v50  ;;  %v1106_v57 = vpack.c.bf16 %v393_v53, %v392_v52  ;;  %v376_v58 = vld [vmem:[%s1633_s1 + $0x70] sm:$0xff]  ;;  %v377_v59 = vld [vmem:[%s1633_s1 + $0x78] sm:$0xff]  ;;  %v539_v1 = vld [vmem:[%s1634_s2] sm:$0xff]  ;;  %p1188_p11 = scmp.ne.s32.totalorder %s1585_s10, %s1187_s27 }
  0x18   : > { %v201_v19 = vld [vmem:[%s1363_s9 + $0x10] sm:$0xff]  ;;  %v199_v20 = vld [vmem:[%s1363_s9] sm:$0xff]  ;;  %v202_v22 = vld [vmem:[%s1363_s9 + $0x18] sm:$0xff]  ;;  %v1108_v62 = vpack.c.bf16 %v377_v59, %v376_v58  ;;  %p1195_p1 = scmp.lt.s32.totalorder %s1193_s22, %s1187_s27 }
  0x19   : > { %225 = vperm.xlu1 %1186, %v201_v19   ;;  %219 = vperm.xlu0 %1185, %v199_v20   ;;  %v200_v23 = vld [vmem:[%s1363_s9 + $0x8] sm:$0xff]  ;;  %v203_v31 = vld [vmem:[%s1363_s9 + $0x20] sm:$0xff]  ;;  %v206_v38 = vld [vmem:[%s1363_s9 + $0x38] sm:$0xff]  ;;  %p1189_p12 = pnand %p1188_p11, %p1319_p5 }
  0x1a   : > { %v204_v30 = vld [vmem:[%s1363_s9 + $0x28] sm:$0xff]  ;;  %1089 = vmatpush3.bf16.msra.mxu0 %v1088_v24  ;;  %1136 = vmatpush3.bf16.msra.mxu1 %v1088_v24  ;;  %v205_v39 = vld [vmem:[%s1363_s9 + $0x30] sm:$0xff]  ;;  %v207_v47 = vld [vmem:[%s1363_s9 + $0x40] sm:$0xff]  ;;  %p1196_p2 = por %p1195_p1, %p1194_p0 }
  0x1b   : > { %1091 = vmatprep.subr.bf16.mxu0 %v1090_v25  ;;  %1129 = vmatprep.subr.bf16.mxu1 %v1090_v25  ;;  %v208_v46 = vld [vmem:[%s1363_s9 + $0x48] sm:$0xff]  ;;  %v211_v54 = vld [vmem:[%s1363_s9 + $0x60] sm:$0xff]  ;;  %v209_v55 = vld [vmem:[%s1363_s9 + $0x50] sm:$0xff]  ;;  %p1190_p13 = pneg %p1189_p12 }
  0x1c   : > { %v212_v60 = vld [vmem:[%s1363_s9 + $0x68] sm:$0xff]  ;;  %v210_v61 = vld [vmem:[%s1363_s9 + $0x58] sm:$0xff]  ;;  %v213_v0 = vld [vmem:[%s1363_s9 + $0x70] sm:$0xff] }
  0x1d   : > { %228 = vperm.xlu1 %1186, %v202_v22   ;;  %222 = vperm.xlu0 %1185, %v200_v23   ;;  %v214_v63 = vld [vmem:[%s1363_s9 + $0x78] sm:$0xff]  ;;  %v540_v2 = vld [vmem:[%s1634_s2 + $0x8] sm:$0xff]  ;;  %v541_v18 = vld [vmem:[%s1634_s2 + $0x10] sm:$0xff]  ;;  %s933_s9 = sshll.u32 %s1302_s19, 11  ;;  %s1591_s19 = scalar_lea.sflag [#allocation3], %s189_s30 }
  0x1e   : > { %1093 = vmatpush3.bf16.msra.mxu0 %v1092_v32  ;;  %1137 = vmatpush3.bf16.msra.mxu1 %v1092_v32  ;;  %v1110_v3 = vpack.c.bf16 %v540_v2, %v539_v1  ;;  %v542_v19 = vld [vmem:[%s1634_s2 + $0x18] sm:$0xff]  ;;  %v543_v27 = vld [vmem:[%s1634_s2 + $0x20] sm:$0xff]  ;;  %v544_v28 = vld [vmem:[%s1634_s2 + $0x28] sm:$0xff]  ;;  %s1583_s13 = scalar_lea.hbm %s1636_s4, %s933_s9  ;;  %p1197_p3 = pnand %p1196_p2, %p1190_p13 }
  0x1f   : > { %1095 = vmatprep.subr.bf16.mxu0 %v1094_v33  ;;  %1130 = vmatprep.subr.bf16.mxu1 %v1094_v33  ;;  %v1114_v22 = vpack.c.bf16 %v542_v19, %v541_v18  ;;  %v1118_v29 = vpack.c.bf16 %v544_v28, %v543_v27 }
  0x21   : > { %234 = vperm.xlu1 %1186, %v204_v30   ;;  %231 = vperm.xlu0 %1185, %v203_v31   ;;  %v545_v30 = vld [vmem:[%s1634_s2 + $0x30] sm:$0xff]  ;;  %v546_v31 = vld [vmem:[%s1634_s2 + $0x38] sm:$0xff] }
  0x22   : > { %1097 = vmatpush3.bf16.msra.mxu0 %v1096_v40  ;;  %1138 = vmatpush3.bf16.msra.mxu1 %v1096_v40  ;;  %v1122_v32 = vpack.c.bf16 %v546_v31, %v545_v30 }
  0x23   : > { %1099 = vmatprep.subr.bf16.mxu0 %v1098_v41  ;;  %1131 = vmatprep.subr.bf16.mxu1 %v1098_v41 }
  0x25   : > { %240 = vperm.xlu1 %1186, %v206_v38   ;;  %237 = vperm.xlu0 %1185, %v205_v39  }
  0x26   : > { %1101 = vmatpush3.bf16.msra.mxu0 %v1100_v48  ;;  %1139 = vmatpush3.bf16.msra.mxu1 %v1100_v48 }
  0x27   : > { %1103 = vmatprep.subr.bf16.mxu0 %v1102_v49  ;;  %1132 = vmatprep.subr.bf16.mxu1 %v1102_v49 }
  0x29   : > { %246 = vperm.xlu1 %1186, %v208_v46   ;;  %243 = vperm.xlu0 %1185, %v207_v47  }
  0x2a   : > { %1105 = vmatpush3.bf16.msra.mxu0 %v1104_v56  ;;  %1140 = vmatpush3.bf16.msra.mxu1 %v1104_v56 }
  0x2b   : > { %1107 = vmatprep.subr.bf16.mxu0 %v1106_v57  ;;  %1133 = vmatprep.subr.bf16.mxu1 %v1106_v57 }
  0x2d   : > { %255 = vperm.xlu1 %1186, %v211_v54   ;;  %249 = vperm.xlu0 %1185, %v209_v55  }
  0x2e   : > { %1109 = vmatpush3.bf16.msra.mxu0 %v1108_v62  ;;  %1141 = vmatpush3.bf16.msra.mxu1 %v1108_v62 }
  0x2f   : > { %1111 = vmatprep.subr.bf16.mxu1 %v1110_v3 }
  0x31   : > { %258 = vperm.xlu1 %1186, %v212_v60   ;;  %252 = vperm.xlu0 %1185, %v210_v61  }
  0x35   : > { %264 = vperm.xlu1 %1186, %v214_v63   ;;  %261 = vperm.xlu0 %1185, %v213_v0  }
  0x98   : > { %v226_v7 = vpop.permute.xlu1 %225  ;;  %v220_v8 = vpop.permute.xlu0 %219 }
  0x99   : > { %vm266_vm0 = vcmp.eq.s32.totalorder %v1453_v5, %v220_v8  ;;  %vm267_vm1 = vcmp.eq.s32.totalorder %v1456_v6, %v220_v8  ;;  %vm271_vm2 = vcmp.eq.s32.totalorder %v1456_v6, %v226_v7  ;;  %vm270_vm5 = vcmp.eq.s32.totalorder %v1453_v5, %v226_v7 }
  0x9a   : > { %879 = vmatprep.mubr.msk.f32.mxu0 %vm267_vm1, %v1252_v9 }
  0x9b   : > { %880 = vmatmul.mubr.msk.f32.vlgmr.msra.gmra.mrb[0].mxu0 %vm266_vm0, %v1252_v9 }
  0x9c   : > { %v229_v10 = vpop.permute.xlu1 %228  ;;  %v223_v11 = vpop.permute.xlu0 %222 }
  0x9d   : > { %vm268_vm3 = vcmp.eq.s32.totalorder %v1453_v5, %v223_v11  ;;  %vm269_vm4 = vcmp.eq.s32.totalorder %v1456_v6, %v223_v11  ;;  %vm273_vm6 = vcmp.eq.s32.totalorder %v1456_v6, %v229_v10  ;;  %vm272_vm7 = vcmp.eq.s32.totalorder %v1453_v5, %v229_v10 }
  0x9e   : > { %881 = vmatprep.mubr.msk.f32.mxu0 %vm269_vm4, %v1252_v9 }
  0x9f   : > { %882 = vmatmul.mubr.msk.f32.gmra.mrb[2].mxu0 %vm268_vm3, %v1252_v9 }
  0xa0   : > { %v235_v12 = vpop.permute.xlu1 %234  ;;  %v232_v13 = vpop.permute.xlu0 %231  ;;  %883 = vmatprep.mubr.msk.f32.mxu0 %vm271_vm2, %v1252_v9 }
  0xa1   : > { %vm275_vm8 = vcmp.eq.s32.totalorder %v1456_v6, %v232_v13  ;;  %vm274_vm9 = vcmp.eq.s32.totalorder %v1453_v5, %v232_v13  ;;  %vm277_vm10 = vcmp.eq.s32.totalorder %v1456_v6, %v235_v12  ;;  %vm276_vm13 = vcmp.eq.s32.totalorder %v1453_v5, %v235_v12 }
  0xa3   : > { %884 = vmatmul.mubr.msk.f32.gmra.mrb[4].mxu0 %vm270_vm5, %v1252_v9 }
  0xa4   : > { %v241_v14 = vpop.permute.xlu1 %240  ;;  %885 = vmatprep.mubr.msk.f32.mxu0 %vm273_vm6, %v1252_v9  ;;  %v238_v15 = vpop.permute.xlu0 %237 }
  0xa5   : > { %vm279_vm14 = vcmp.eq.s32.totalorder %v1456_v6, %v238_v15  ;;  %vm278_vm1 = vcmp.eq.s32.totalorder %v1453_v5, %v238_v15  ;;  %vm281_vm2 = vcmp.eq.s32.totalorder %v1456_v6, %v241_v14  ;;  %vm280_vm5 = vcmp.eq.s32.totalorder %v1453_v5, %v241_v14 }
  0xa7   : > { %886 = vmatmul.mubr.msk.f32.gmra.mrb[6].mxu0 %vm272_vm7, %v1252_v9 }
  0xa8   : > { %v247_v16 = vpop.permute.xlu1 %246  ;;  %887 = vmatprep.mubr.msk.f32.mxu0 %vm275_vm8, %v1252_v9  ;;  %v244_v17 = vpop.permute.xlu0 %243 }
  0xa9   : > { %vm283_vm6 = vcmp.eq.s32.totalorder %v1456_v6, %v244_v17  ;;  %vm282_vm8 = vcmp.eq.s32.totalorder %v1453_v5, %v244_v17  ;;  %v911_v17 = vld [vmem:[%s1635_s3] ss:$0 sm:$0xff] }
  0xab   : > { %888 = vmatmul.mubr.msk.f32.gmra.mrb[8].mxu0 %vm274_vm9, %v1252_v9 }
  0xac   : > { %v256_v20 = vpop.permute.xlu1 %255  ;;  %889 = vmatprep.mubr.msk.f32.mxu0 %vm277_vm10, %v1252_v9  ;;  %v250_v21 = vpop.permute.xlu0 %249  ;;  %vm285_vm10 = vcmp.eq.s32.totalorder %v1456_v6, %v247_v16 }
  0xad   : > { %vm290_vm11 = vcmp.eq.s32.totalorder %v1453_v5, %v256_v20  ;;  %vm291_vm12 = vcmp.eq.s32.totalorder %v1456_v6, %v256_v20 }
  0xae   : > { %903 = vmatprep.mubr.msk.f32.mxu1 %vm291_vm12, %v1252_v9  ;;  %vm287_vm12 = vcmp.eq.s32.totalorder %v1456_v6, %v250_v21 }
  0xaf   : > { %890 = vmatmul.mubr.msk.f32.gmra.mrb[10].mxu0 %vm276_vm13, %v1252_v9  ;;  %904 = vmatmul.mubr.msk.f32.vlgmr.msra.gmra.mrb[0].mxu1 %vm290_vm11, %v1252_v9  ;;  %vm284_vm11 = vcmp.eq.s32.totalorder %v1453_v5, %v247_v16  ;;  %vm286_vm13 = vcmp.eq.s32.totalorder %v1453_v5, %v250_v21 }
  0xb0   : > { %v259_v23 = vpop.permute.xlu1 %258  ;;  %891 = vmatprep.mubr.msk.f32.mxu0 %vm279_vm14, %v1252_v9  ;;  %v253_v24 = vpop.permute.xlu0 %252  ;;  %1113 = vmatpush3.bf16.msra.mxu1 %v1110_v3 }
  0xb1   : > { %vm292_vm15 = vcmp.eq.s32.totalorder %v1453_v5, %v259_v23  ;;  %vm293_vm0 = vcmp.eq.s32.totalorder %v1456_v6, %v259_v23  ;;  %1115 = vmatprep.subr.bf16.mxu1 %v1114_v22  ;;  %vm289_vm14 = vcmp.eq.s32.totalorder %v1456_v6, %v253_v24 }
  0xb2   : > { %905 = vmatprep.mubr.msk.f32.mxu1 %vm293_vm0, %v1252_v9  ;;  %vm554_vm0 = vcmask 523264  }
  0xb3   : > { %892 = vmatmul.mubr.msk.f32.gmra.mrb[12].mxu0 %vm278_vm1, %v1252_v9  ;;  %906 = vmatmul.mubr.msk.f32.gmra.mrb[2].mxu1 %vm292_vm15, %v1252_v9  ;;  %vm288_vm15 = vcmp.eq.s32.totalorder %v1453_v5, %v253_v24 }
  0xb4   : > { %v265_v25 = vpop.permute.xlu1 %264  ;;  %893 = vmatprep.mubr.msk.f32.mxu0 %vm281_vm2, %v1252_v9  ;;  %v262_v26 = vpop.permute.xlu0 %261  ;;  %1117 = vmatpush3.bf16.msra.mxu1 %v1114_v22 }
  0xb5   : > { %vm294_vm3 = vcmp.eq.s32.totalorder %v1453_v5, %v262_v26  ;;  %vm295_vm4 = vcmp.eq.s32.totalorder %v1456_v6, %v262_v26  ;;  %vm297_vm7 = vcmp.eq.s32.totalorder %v1456_v6, %v265_v25  ;;  %vm296_vm9 = vcmp.eq.s32.totalorder %v1453_v5, %v265_v25  ;;  %1119 = vmatprep.subr.bf16.mxu1 %v1118_v29 }
  0xb6   : > { %907 = vmatprep.mubr.msk.f32.mxu1 %vm295_vm4, %v1252_v9 }
  0xb7   : > { %894 = vmatmul.mubr.msk.f32.gmra.mrb[14].mxu0 %vm280_vm5, %v1252_v9  ;;  %908 = vmatmul.mubr.msk.f32.gmra.mrb[4].mxu1 %vm294_vm3, %v1252_v9 }
  0xb8   : > { %895 = vmatprep.mubr.msk.f32.mxu0 %vm283_vm6, %v1252_v9  ;;  %909 = vmatprep.mubr.msk.f32.mxu1 %vm297_vm7, %v1252_v9 }
  0xb9   : > { %1121 = vmatpush3.bf16.msra.mxu1 %v1118_v29 }
  0xba   : > { %1123 = vmatprep.subr.bf16.mxu1 %v1122_v32 }
  0xbb   : > { %896 = vmatmul.mubr.msk.f32.gmra.mrb[16].mxu0 %vm282_vm8, %v1252_v9  ;;  %910 = vmatmul.mubr.msk.f32.gmra.mrb[6].mxu1 %vm296_vm9, %v1252_v9 }
  0xbc   : > { %897 = vmatprep.mubr.msk.f32.mxu0 %vm285_vm10, %v1252_v9 }
  0xbd   : > { %1125 = vmatpush3.bf16.msra.mxu1 %v1122_v32 }
  0xbf   : > { %898 = vmatmul.mubr.msk.f32.gmra.mrb[18].mxu0 %vm284_vm11, %v1252_v9 }
  0xc0   : > { %899 = vmatprep.mubr.msk.f32.mxu0 %vm287_vm12, %v1252_v9 }
  0xc3   : > { %900 = vmatmul.mubr.msk.f32.gmra.mrb[20].mxu0 %vm286_vm13, %v1252_v9 }
  0xc4   : > { %901 = vmatprep.mubr.msk.f32.mxu0 %vm289_vm14, %v1252_v9 }
  0xc7   : > { %902 = vmatmul.mubr.msk.f32.gmra.mrb[22].mxu0 %vm288_vm15, %v1252_v9 }
 0x16e   : > { %v966_v33 = vpop.f32.mrb[0].mxu0 }
 0x16f   : > { %v967_v34 = vpop.f32.mrb[1].mxu0 }
 0x170   : > { %v968_v35 = vadd.f32 %v967_v34, %v966_v33 }
 0x172   : > { %v969_v36 = vpop.f32.mrb[2].mxu0  ;;  %1054 = vmatprep.mubr.msk.f32.mxu1 %vm554_vm0, %v968_v35 }
 0x173   : > { %v970_v37 = vpop.f32.mrb[3].mxu0 }
 0x174   : > { %v971_v38 = vadd.f32 %v970_v37, %v969_v36 }
 0x176   : > { %v972_v39 = vpop.f32.mrb[4].mxu0  ;;  %1055 = vmatmul.mubr.msk.f32.vlgmr.msra.gmra.mrb[8].mxu1 %vm554_vm0, %v971_v38 }
 0x177   : > { %v973_v40 = vpop.f32.mrb[5].mxu0 }
 0x178   : > { %v974_v41 = vadd.f32 %v973_v40, %v972_v39 }
 0x17a   : > { %v975_v42 = vpop.f32.mrb[6].mxu0  ;;  %1057 = vmatprep.mubr.msk.f32.mxu1 %vm554_vm0, %v974_v41 }
 0x17b   : > { %v976_v43 = vpop.f32.mrb[7].mxu0 }
 0x17c   : > { %v977_v44 = vadd.f32 %v976_v43, %v975_v42 }
 0x17e   : > { %v978_v45 = vpop.f32.mrb[8].mxu0  ;;  %1058 = vmatmul.mubr.msk.f32.gmra.mrb[10].mxu1 %vm554_vm0, %v977_v44 }
 0x17f   : > { %v979_v46 = vpop.f32.mrb[9].mxu0 }
 0x180   : > { %v980_v47 = vadd.f32 %v979_v46, %v978_v45 }
 0x182   : > { %v981_v48 = vpop.f32.mrb[10].mxu0  ;;  %v1002_v49 = vpop.f32.mrb[0].mxu1  ;;  %1060 = vmatprep.mubr.msk.f32.mxu1 %vm554_vm0, %v980_v47 }
 0x183   : > { %v982_v50 = vpop.f32.mrb[11].mxu0  ;;  %v1003_v51 = vpop.f32.mrb[1].mxu1 }
 0x184   : > { %v983_v52 = vadd.f32 %v982_v50, %v981_v48  ;;  %v1004_v53 = vadd.f32 %v1003_v51, %v1002_v49 }
 0x186   : > { %v984_v54 = vpop.f32.mrb[12].mxu0  ;;  %v1005_v55 = vpop.f32.mrb[2].mxu1  ;;  %1061 = vmatmul.mubr.msk.f32.gmra.mrb[12].mxu1 %vm554_vm0, %v983_v52 }
 0x187   : > { %v985_v56 = vpop.f32.mrb[13].mxu0  ;;  %v1006_v57 = vpop.f32.mrb[3].mxu1 }
 0x188   : > { %v986_v58 = vadd.f32 %v985_v56, %v984_v54  ;;  %v1007_v59 = vadd.f32 %v1006_v57, %v1005_v55 }
 0x18a   : > { %v987_v60 = vpop.f32.mrb[14].mxu0  ;;  %v1008_v61 = vpop.f32.mrb[4].mxu1  ;;  %1063 = vmatprep.mubr.msk.f32.mxu1 %vm554_vm0, %v986_v58 }
 0x18b   : > { %v988_v62 = vpop.f32.mrb[15].mxu0  ;;  %v1009_v63 = vpop.f32.mrb[5].mxu1 }
 0x18c   : > { %v989_v0 = vadd.f32 %v988_v62, %v987_v60  ;;  %v1010_v1 = vadd.f32 %v1009_v63, %v1008_v61 }
 0x18e   : > { %v990_v2 = vpop.f32.mrb[16].mxu0  ;;  %v1011_v3 = vpop.f32.mrb[6].mxu1  ;;  %1064 = vmatmul.mubr.msk.f32.gmra.mrb[14].mxu1 %vm554_vm0, %v989_v0 }
 0x18f   : > { %v991_v4 = vpop.f32.mrb[17].mxu0  ;;  %v1012_v5 = vpop.f32.mrb[7].mxu1 }
 0x190   : > { %v992_v6 = vadd.f32 %v991_v4, %v990_v2  ;;  %v1013_v7 = vadd.f32 %v1012_v5, %v1011_v3 }
 0x192   : > { %v993_v8 = vpop.f32.mrb[18].mxu0  ;;  %1066 = vmatprep.mubr.msk.f32.mxu1 %vm554_vm0, %v992_v6 }
 0x193   : > { %v994_v9 = vpop.f32.mrb[19].mxu0 }
 0x194   : > { %v995_v10 = vadd.f32 %v994_v9, %v993_v8 }
 0x196   : > { %v996_v11 = vpop.f32.mrb[20].mxu0  ;;  %1067 = vmatmul.mubr.msk.f32.gmra.mrb[16].mxu1 %vm554_vm0, %v995_v10 }
 0x197   : > { %v997_v12 = vpop.f32.mrb[21].mxu0 }
 0x198   : > { %v998_v13 = vadd.f32 %v997_v12, %v996_v11 }
 0x19a   : > { %v999_v14 = vpop.f32.mrb[22].mxu0  ;;  %1069 = vmatprep.mubr.msk.f32.mxu1 %vm554_vm0, %v998_v13 }
 0x19b   : > { %v1000_v15 = vpop.f32.mrb[23].mxu0 }
 0x19c   : > { %v1001_v16 = vadd.f32 %v1000_v15, %v999_v14 }
 0x19e   : > { %1070 = vmatmul.mubr.msk.f32.gmra.mrb[18].mxu1 %vm554_vm0, %v1001_v16 }
 0x19f   : > { %1072 = vmatprep.mubr.msk.f32.mxu1 %vm554_vm0, %v1004_v53 }
 0x1a2   : > { %1073 = vmatmul.mubr.msk.f32.gmra.mrb[20].mxu1 %vm554_vm0, %v1007_v59 }
 0x1a3   : > { %1075 = vmatprep.mubr.msk.f32.mxu1 %vm554_vm0, %v1010_v1 }
 0x1a6   : > { %1076 = vmatmul.mubr.msk.f32.gmra.mrb[22].mxu1 %vm554_vm0, %v1013_v7 }
 0x249   : > { %v1056_v18 = vpop.f32.mrb[8].mxu1 }
 0x24a   : > { %v675_v19 = vadd.f32 %v1056_v18, %v911_v17  ;;  %v669_v20 = vpop.f32.mrb[9].mxu1 }
 0x24b   : > { %v670_v21 = vadd.f32 %v911_v17, %v669_v20 }
 0x24c   : > { %749 = vst [vmem:[%s1562_s8 + $0x8] sm:$0xff] %v675_v19 }
 0x24d   : > { %748 = vst [vmem:[%s1562_s8] sm:$0xff] %v670_v21 }
 0x251   : > { %v1059_v22 = vpop.f32.mrb[10].mxu1 }
 0x252   : > { %v685_v23 = vadd.f32 %v1059_v22, %v911_v17  ;;  %v679_v24 = vpop.f32.mrb[11].mxu1 }
 0x253   : > { %v680_v25 = vadd.f32 %v911_v17, %v679_v24 }
 0x254   : > { %751 = vst [vmem:[%s1562_s8 + $0x18] sm:$0xff] %v685_v23 }
 0x255   : > { %750 = vst [vmem:[%s1562_s8 + $0x10] sm:$0xff] %v680_v25 }
 0x259   : > { %v1062_v26 = vpop.f32.mrb[12].mxu1 }
 0x25a   : > { %v695_v27 = vadd.f32 %v1062_v26, %v911_v17  ;;  %v689_v28 = vpop.f32.mrb[13].mxu1 }
 0x25b   : > { %v690_v29 = vadd.f32 %v911_v17, %v689_v28 }
 0x25c   : > { %753 = vst [vmem:[%s1562_s8 + $0x28] sm:$0xff] %v695_v27 }
 0x25d   : > { %752 = vst [vmem:[%s1562_s8 + $0x20] sm:$0xff] %v690_v29 }
 0x261   : > { %v1065_v30 = vpop.f32.mrb[14].mxu1 }
 0x262   : > { %v705_v31 = vadd.f32 %v1065_v30, %v911_v17  ;;  %v699_v32 = vpop.f32.mrb[15].mxu1 }
 0x263   : > { %v700_v33 = vadd.f32 %v911_v17, %v699_v32 }
 0x264   : > { %755 = vst [vmem:[%s1562_s8 + $0x38] sm:$0xff] %v705_v31 }
 0x265   : > { %754 = vst [vmem:[%s1562_s8 + $0x30] sm:$0xff] %v700_v33 }
 0x269   : > { %v1068_v34 = vpop.f32.mrb[16].mxu1 }
 0x26a   : > { %v715_v35 = vadd.f32 %v1068_v34, %v911_v17  ;;  %v709_v36 = vpop.f32.mrb[17].mxu1 }
 0x26b   : > { %v710_v37 = vadd.f32 %v911_v17, %v709_v36 }
 0x26c   : > { %757 = vst [vmem:[%s1562_s8 + $0x48] sm:$0xff] %v715_v35 }
 0x26d   : > { %756 = vst [vmem:[%s1562_s8 + $0x40] sm:$0xff] %v710_v37 }
 0x271   : > { %v1071_v38 = vpop.f32.mrb[18].mxu1 }
 0x272   : > { %v725_v39 = vadd.f32 %v1071_v38, %v911_v17  ;;  %v719_v40 = vpop.f32.mrb[19].mxu1 }
 0x273   : > { %v720_v41 = vadd.f32 %v911_v17, %v719_v40 }
 0x274   : > { %759 = vst [vmem:[%s1562_s8 + $0x58] sm:$0xff] %v725_v39 }
 0x275   : > { %758 = vst [vmem:[%s1562_s8 + $0x50] sm:$0xff] %v720_v41  ;;  %v1074_v42 = vpop.f32.mrb[20].mxu1 }
 0x276   : > { %v735_v43 = vadd.f32 %v1074_v42, %v911_v17  ;;  %v729_v44 = vpop.f32.mrb[21].mxu1 }
 0x277   : > { %v730_v45 = vadd.f32 %v911_v17, %v729_v44 }
 0x278   : > { %761 = vst [vmem:[%s1562_s8 + $0x68] sm:$0xff] %v735_v43 }
 0x279   : > { %760 = vst [vmem:[%s1562_s8 + $0x60] sm:$0xff] %v730_v45  ;;  %v1077_v46 = vpop.f32.mrb[22].mxu1 }
 0x27a   : > { %v745_v47 = vadd.f32 %v1077_v46, %v911_v17  ;;  %v739_v48 = vpop.f32.mrb[23].mxu1 }
 0x27b   : > { %v740_v49 = vadd.f32 %v911_v17, %v739_v48 }
 0x27c   : > { %763 = vst [vmem:[%s1562_s8 + $0x78] sm:$0xff] %v745_v47 }
 0x27d   : > { %762 = vst [vmem:[%s1562_s8 + $0x70] sm:$0xff] %v740_v49 }
 0x27e   : > { %1200 = shalt.err (!%p1197_p3)
}
 0x27f   : > { %s1201_s23 = scalar_lea.hbm %s1583_s13, 2048  ;;  %s1205_s30 = scalar_lea.hbm %s1636_s4, 4096 }
 0x280   : > { %p1202_p4 = scmp.ne.s32.totalorder %s1583_s13, %s1201_s23  ;;  %p1206_p9 = scmp.lt.u32.totalorder %s1583_s13, %s1636_s4 }
 0x281   : > { %p1207_p10 = scmp.lt.u32.totalorder %s1205_s30, %s1201_s23  ;;  %p1209_p12 = scmp.lt.u32.totalorder %s1201_s23, %s1583_s13 }
 0x282   : > { %p1203_p7 = pnand %p1202_p4, %p1319_p5 }
 0x283   : > { %p1208_p11 = por %p1207_p10, %p1206_p9 }
 0x284   : > { %p1204_p8 = pneg %p1203_p7 }
 0x285   : > { %p1210_p13 = por %p1209_p12, %p1208_p11 }
 0x287   : > { %p1211_p0 = pnand %p1210_p13, %p1204_p8 }
 0x289   : > { %1214 = shalt.err (!%p1211_p0)
}
 0x28a   : > { %s1254_s7 = smov 128   ;;  %s1255_s8 = smov 8  }
 0x28b   : > { %1142 = dma.vmem_to_hbm [thread:$0]  (%p1319_p5), %s1585_s10, 2048, %s1583_s13, %s1591_s19, %s1254_s7, %s1254_s7, %s1255_s8  }
 0x28c PF: > { %p1148_p1 = scmp.ge.s32.totalorder %s1249_s18, 2  ;;  %s793_s9 = sand.u32 1, %s1237_s15  }
 0x28d   : > { %s794_s11 = scalar_lea.sflag [#allocation3], %s793_s9 }
 0x28e   : > { %p1145_p2 = pnand %p1148_p1, %p1323_p6 }
 0x290   : > { %1232 = dma.done.wait (!%p1145_p2), %s794_s11, 2048  }
 0x291   : > { %1234 = vsyncadd (!%p1145_p2), %s794_s11, 4294965248  ;;  %p14_p3 = scmp.ge.s32.totalorder %s1306_s21, 4   ;;  %s1639_s15 = smov %s1241_s16 }
 0x292   : > { %s1640_s16 = smov %s1245_s17  ;;  %s1641_s17 = smov %s1317_s24 }
 0x293   : > { %s1642_s18 = smov %s1306_s21  ;;  %16 = sbr.rel (!%p14_p3) target bundleno = 3 (0x3), region = 71 }
 0x29a   :  { %799 = vsyncpa [#allocation3], 1 }
 0x29b   :  { %801 = vsyncpa [#allocation3 + $0x1], 1 }

</bundles_post_ra>
